<compile_context>
chip_gen: v7x
topology: tpu7x:2x2x1
jax: 0.10.0
libtpu: 0.0.40
codegen_flags: <defaults>
</compile_context>

<pallas_src>
import functools

import jax
import jax.numpy as jnp
from jax.experimental import pallas as pl
from jax.experimental.pallas import tpu as pltpu

_LANES = 128
_NEG_BIG = -1e30  # softmax mask baked into the padded bias lanes


def _round_up(n, m):
    return ((n + m - 1) // m) * m


def _gelu(x, approximate):
    if approximate:
        # tanh-approx GELU: tanh rides the EUP slot (VALU relief) but deviates
        # slightly from PyTorch nn.GELU()'s exact erf default.
        c = 0.7978845608028654  # sqrt(2/pi)
        return 0.5 * x * (1.0 + jnp.tanh(c * (x + 0.044715 * x * x * x)))
    # PyTorch nn.GELU() default = exact (erf-based) GELU.
    return 0.5 * x * (1.0 + jax.lax.erf(x * 0.7071067811865476))


def reinforce_mlp_kernel(x_ref, w1_ref, b1_ref, w2_ref, b2_ref, w3_ref, b3_ref,
                         o_ref, *, approximate_gelu):
    # Linear 1 + GELU (x already bf16; bf16 MXU inputs, f32 accumulate).
    h = jnp.dot(x_ref[...], w1_ref[...],
                preferred_element_type=jnp.float32) + b1_ref[...]
    h = _gelu(h, approximate_gelu)

    # Linear 2 + GELU.
    h = jnp.dot(h.astype(jnp.bfloat16), w2_ref[...],
                preferred_element_type=jnp.float32) + b2_ref[...]
    h = _gelu(h, approximate_gelu)

    # Linear 3 (policy head; action dim padded to 128 lanes for lane-dense
    # stores).  Padded lanes already carry a -1e30 bias -> exp underflows to 0,
    # so no in-kernel iota/where mask is needed.
    logits = jnp.dot(h.astype(jnp.bfloat16), w3_ref[...],
                     preferred_element_type=jnp.float32) + b3_ref[...]

    # Numerically stable softmax; reciprocal on the EUP + one Newton step.
    m = jnp.max(logits, axis=-1, keepdims=True)
    e = jnp.exp(logits - m)
    s = jnp.sum(e, axis=-1, keepdims=True)
    r = pl.reciprocal(s, approx=True)
    r = r * (2.0 - s * r)            # Newton refine -> ~f32-accurate 1/s
    o_ref[...] = (e * r).astype(o_ref.dtype)


def prepare_params(w1, b1, w2, b2, w3, b3):
    """One-time parameter prep (do NOT call per forward step).

    Pads the action dim of the policy head to a multiple of 128 lanes, bakes
    the softmax lane mask into the padded bias, and casts matmul weights to
    bf16 (MXU input dtype).  Weights are (in, out) = PyTorch weight.T.
    """
    n_actions = w3.shape[1]
    n_pad = _round_up(max(n_actions, 1), _LANES)
    w3p = jnp.pad(w3, ((0, 0), (0, n_pad - n_actions)))
    b3p = jnp.pad(b3.reshape(1, -1), ((0, 0), (0, n_pad - n_actions)),
                  constant_values=_NEG_BIG)
    return (w1.astype(jnp.bfloat16),
            b1.reshape(1, -1).astype(jnp.float32),
            w2.astype(jnp.bfloat16),
            b2.reshape(1, -1).astype(jnp.float32),
            w3p.astype(jnp.bfloat16),
            b3p.astype(jnp.float32))


@functools.partial(
    jax.jit,
    static_argnames=("n_actions", "block_b", "approximate_gelu", "return_padded"))
def reinforce_forward(x, params, n_actions, *, block_b=2048,
                      approximate_gelu=False, return_padded=False):
    """x: (B, D_in).  params: output of prepare_params()."""
    w1b, b1, w2b, b2, w3b, b3p = params
    B, D = x.shape
    n_pad = w3b.shape[1]

    # Stream x as bf16: halves the only per-step input DMA; MXU wants bf16.
    xb = x if x.dtype == jnp.bfloat16 else x.astype(jnp.bfloat16)

    # Batch tile: multiple of 8 sublanes, large enough to amortize the ~0.35us
    # per-grid-step pipeline overhead, small enough for v7x's 32 MiB scoped
    # VMEM default (tb=2048 -> ~5 MiB live incl. double buffering).
    tb = max(8, min(block_b, _round_up(B, 8)))
    if B >= 512:
        # Keep >= 2 grid steps so ("parallel",) can shard across v7x's 2 TCs.
        tb = min(tb, _round_up(pl.cdiv(B, 2), 8))
    grid = (pl.cdiv(B, tb),)

    flops = 2 * B * (D * 128 + 128 * 128 + 128 * n_pad)
    transcendentals = B * (128 + 128 + n_pad)          # 2x GELU + softmax exp
    bytes_accessed = (int(xb.size) * xb.dtype.itemsize
                      + sum(int(p.size) * p.dtype.itemsize for p in params)
                      + B * n_pad * 4)

    kernel = functools.partial(reinforce_mlp_kernel,
                               approximate_gelu=approximate_gelu)

    out = pl.pallas_call(
        kernel,
        out_shape=jax.ShapeDtypeStruct((B, n_pad), jnp.float32),
        grid=grid,
        in_specs=[
            pl.BlockSpec((tb, D), lambda i: (i, 0)),      # x: tiled over batch
            pl.BlockSpec(w1b.shape, lambda i: (0, 0)),    # weights / biases:
            pl.BlockSpec(b1.shape, lambda i: (0, 0)),     # constant-index,
            pl.BlockSpec(w2b.shape, lambda i: (0, 0)),    # VMEM-resident
            pl.BlockSpec(b2.shape, lambda i: (0, 0)),     # across grid steps
            pl.BlockSpec(w3b.shape, lambda i: (0, 0)),
            pl.BlockSpec(b3p.shape, lambda i: (0, 0)),
        ],
        out_specs=pl.BlockSpec((tb, n_pad), lambda i: (i, 0)),
        compiler_params=pltpu.CompilerParams(
            dimension_semantics=("parallel",)),           # megacore on v7x
        cost_estimate=pl.CostEstimate(flops=flops,
                                      transcendentals=transcendentals,
                                      bytes_accessed=bytes_accessed),
    )(xb, w1b, b1, w2b, b2, w3b, b3p)

    if return_padded:
        # Padded action lanes are exactly 0; downstream consumers (sampling,
        # log-prob) can use the 128-lane slab directly and skip the slice pass.
        return out
    return out[:, :n_actions]


def init_params(key, d_in, n_actions):
    """Deterministic synthetic parameters (shapes match the nn.Linear layers)."""
    ks = jax.random.split(key, 6)
    # PyTorch Linear stores weight as (out, in); we keep (in, out) = weight.T.
    w1 = jax.random.normal(ks[0], (d_in, 128), jnp.float32) * (1.0 / jnp.sqrt(d_in))
    b1 = jax.random.normal(ks[1], (1, 128), jnp.float32) * 0.01
    w2 = jax.random.normal(ks[2], (128, 128), jnp.float32) * (1.0 / jnp.sqrt(128.0))
    b2 = jax.random.normal(ks[3], (1, 128), jnp.float32) * 0.01
    w3 = jax.random.normal(ks[4], (128, n_actions), jnp.float32) * (1.0 / jnp.sqrt(128.0))
    b3 = jax.random.normal(ks[5], (1, n_actions), jnp.float32) * 0.01
    return w1, b1, w2, b2, w3, b3


def reference_forward_bf16(x, w1, b1, w2, b2, w3, b3):
    """Matches the kernel's dtype path: bf16 matmul inputs, f32 accumulate."""
    def mm(a, w):
        return jnp.dot(a.astype(jnp.bfloat16), w.astype(jnp.bfloat16),
                       preferred_element_type=jnp.float32)
    h = jax.nn.gelu(mm(x, w1) + b1, approximate=False)
    h = jax.nn.gelu(mm(h, w2) + b2, approximate=False)
    return jax.nn.softmax(mm(h, w3) + b3, axis=-1)


def reference_forward_f32(x, w1, b1, w2, b2, w3, b3):
    """Pure f32 reference (PyTorch-equivalent numerics)."""
    h = jax.nn.gelu(x @ w1 + b1, approximate=False)
    h = jax.nn.gelu(h @ w2 + b2, approximate=False)
    return jax.nn.softmax(h @ w3 + b3, axis=-1)


if __name__ == "__main__":
    key = jax.random.PRNGKey(0)
    k_x, k_x2, k_p = jax.random.split(key, 3)

    # input_size=(32,), n_actions=6.
    D_IN, N_ACTIONS = 32, 6
    raw = init_params(k_p, D_IN, N_ACTIONS)
    params = prepare_params(*raw)

    # Small batch: exercises a single partial tile (B not a multiple of 8)
    # and the padded-lane softmax mask.
    B = 10
    x = jax.random.normal(k_x, (B, D_IN), jnp.float32)
    out = jax.block_until_ready(reinforce_forward(x, params, n_actions=N_ACTIONS))

    ref_bf16 = reference_forward_bf16(x, *raw)
    ref_f32 = reference_forward_f32(x, *raw)
    assert out.shape == (B, N_ACTIONS)
    assert jnp.allclose(jnp.sum(out, axis=-1), 1.0, atol=1e-4)
    # Tight check vs. a reference using the same bf16-input / f32-accum path.
    assert jnp.allclose(out, ref_bf16, atol=1e-4, rtol=1e-4)
    # Loose check vs. pure-f32 (PyTorch-equivalent) reference; only difference
    # is bf16 matmul inputs (documented perf tradeoff).
    assert jnp.allclose(out, ref_f32, atol=2e-2)

    # Larger batch: exercises the multi-step batch grid (>= 2 steps for
    # megacore sharding) and the clipped partial last block.
    B2 = 530
    x2 = jax.random.normal(k_x2, (B2, D_IN), jnp.float32)
    out2 = jax.block_until_ready(reinforce_forward(x2, params, n_actions=N_ACTIONS))
    ref2 = reference_forward_bf16(x2, *raw)
    assert out2.shape == (B2, N_ACTIONS)
    assert jnp.allclose(jnp.sum(out2, axis=-1), 1.0, atol=1e-4)
    assert jnp.allclose(out2, ref2, atol=1e-4, rtol=1e-4)

    print("KERNEL_OK")
</pallas_src>

<mosaic_0001>
module attributes {stable_mosaic.version = 11 : i64} {
  func.func @reinforce_mlp_kernel(%arg0: i32, %arg1: memref<16x32xbf16, #tpu.memory_space<vmem>>, %arg2: memref<32x128xbf16, #tpu.memory_space<vmem>>, %arg3: memref<1x128xf32, #tpu.memory_space<vmem>>, %arg4: memref<128x128xbf16, #tpu.memory_space<vmem>>, %arg5: memref<1x128xf32, #tpu.memory_space<vmem>>, %arg6: memref<128x128xbf16, #tpu.memory_space<vmem>>, %arg7: memref<1x128xf32, #tpu.memory_space<vmem>>, %arg8: memref<16x128xf32, #tpu.memory_space<vmem>>) attributes {dimension_semantics = [#tpu.dimension_semantics<parallel>], iteration_bounds = array<i64: 1>, scalar_prefetch = 0 : i64, scratch_operands = 0 : i64, tpu.core_type = #tpu.core_type<tc>, window_params = [{transform_indices = @transform_0, window_bounds = array<i64: 16, 32>}, {pipeline_mode = #tpu.pipeline_mode<synchronous>, transform_indices = @transform_1, window_bounds = array<i64: 32, 128>}, {pipeline_mode = #tpu.pipeline_mode<synchronous>, transform_indices = @transform_2, window_bounds = array<i64: 1, 128>}, {pipeline_mode = #tpu.pipeline_mode<synchronous>, transform_indices = @transform_3, window_bounds = array<i64: 128, 128>}, {pipeline_mode = #tpu.pipeline_mode<synchronous>, transform_indices = @transform_4, window_bounds = array<i64: 1, 128>}, {pipeline_mode = #tpu.pipeline_mode<synchronous>, transform_indices = @transform_5, window_bounds = array<i64: 128, 128>}, {pipeline_mode = #tpu.pipeline_mode<synchronous>, transform_indices = @transform_6, window_bounds = array<i64: 1, 128>}, {transform_indices = @transform_7, window_bounds = array<i64: 16, 128>}]} {
    %c0 = arith.constant 0 : index
    %c0_0 = arith.constant 0 : index
    %0 = vector.load %arg1[%c0, %c0_0] : memref<16x32xbf16, #tpu.memory_space<vmem>>, vector<16x32xbf16>
    %c0_1 = arith.constant 0 : index
    %c0_2 = arith.constant 0 : index
    %1 = vector.load %arg2[%c0_1, %c0_2] : memref<32x128xbf16, #tpu.memory_space<vmem>>, vector<32x128xbf16>
    %cst = arith.constant dense<0.000000e+00> : vector<16x128xf32>
    %2 = tpu.matmul %0, %1, %cst {dimension_numbers = #tpu.dot_dimension_numbers<[1], [0], [0], [1], [0, 0, 1, 1], [], []>} : vector<16x32xbf16>, vector<32x128xbf16>, vector<16x128xf32> -> vector<16x128xf32>
    %c0_3 = arith.constant 0 : index
    %c0_4 = arith.constant 0 : index
    %3 = vector.load %arg3[%c0_3, %c0_4] : memref<1x128xf32, #tpu.memory_space<vmem>>, vector<1x128xf32>
    %4 = vector.broadcast %3 : vector<1x128xf32> to vector<16x128xf32>
    %5 = arith.addf %2, %4 : vector<16x128xf32>
    %cst_5 = arith.constant 5.000000e-01 : f32
    %6 = vector.broadcast %cst_5 : f32 to vector<16x128xf32>
    %7 = arith.mulf %6, %5 : vector<16x128xf32>
    %cst_6 = arith.constant 0.707106769 : f32
    %8 = vector.broadcast %cst_6 : f32 to vector<16x128xf32>
    %9 = arith.mulf %5, %8 : vector<16x128xf32>
    %10 = math.erf %9 : vector<16x128xf32>
    %cst_7 = arith.constant 1.000000e+00 : f32
    %11 = vector.broadcast %cst_7 : f32 to vector<16x128xf32>
    %12 = arith.addf %11, %10 : vector<16x128xf32>
    %13 = arith.mulf %7, %12 : vector<16x128xf32>
    %14 = arith.truncf %13 : vector<16x128xf32> to vector<16x128xbf16>
    %c0_8 = arith.constant 0 : index
    %c0_9 = arith.constant 0 : index
    %15 = vector.load %arg4[%c0_8, %c0_9] : memref<128x128xbf16, #tpu.memory_space<vmem>>, vector<128x128xbf16>
    %cst_10 = arith.constant dense<0.000000e+00> : vector<16x128xf32>
    %16 = tpu.matmul %14, %15, %cst_10 {dimension_numbers = #tpu.dot_dimension_numbers<[1], [0], [0], [1], [0, 0, 1, 1], [], []>} : vector<16x128xbf16>, vector<128x128xbf16>, vector<16x128xf32> -> vector<16x128xf32>
    %c0_11 = arith.constant 0 : index
    %c0_12 = arith.constant 0 : index
    %17 = vector.load %arg5[%c0_11, %c0_12] : memref<1x128xf32, #tpu.memory_space<vmem>>, vector<1x128xf32>
    %18 = vector.broadcast %17 : vector<1x128xf32> to vector<16x128xf32>
    %19 = arith.addf %16, %18 : vector<16x128xf32>
    %cst_13 = arith.constant 5.000000e-01 : f32
    %20 = vector.broadcast %cst_13 : f32 to vector<16x128xf32>
    %21 = arith.mulf %20, %19 : vector<16x128xf32>
    %cst_14 = arith.constant 0.707106769 : f32
    %22 = vector.broadcast %cst_14 : f32 to vector<16x128xf32>
    %23 = arith.mulf %19, %22 : vector<16x128xf32>
    %24 = math.erf %23 : vector<16x128xf32>
    %cst_15 = arith.constant 1.000000e+00 : f32
    %25 = vector.broadcast %cst_15 : f32 to vector<16x128xf32>
    %26 = arith.addf %25, %24 : vector<16x128xf32>
    %27 = arith.mulf %21, %26 : vector<16x128xf32>
    %28 = arith.truncf %27 : vector<16x128xf32> to vector<16x128xbf16>
    %c0_16 = arith.constant 0 : index
    %c0_17 = arith.constant 0 : index
    %29 = vector.load %arg6[%c0_16, %c0_17] : memref<128x128xbf16, #tpu.memory_space<vmem>>, vector<128x128xbf16>
    %cst_18 = arith.constant dense<0.000000e+00> : vector<16x128xf32>
    %30 = tpu.matmul %28, %29, %cst_18 {dimension_numbers = #tpu.dot_dimension_numbers<[1], [0], [0], [1], [0, 0, 1, 1], [], []>} : vector<16x128xbf16>, vector<128x128xbf16>, vector<16x128xf32> -> vector<16x128xf32>
    %c0_19 = arith.constant 0 : index
    %c0_20 = arith.constant 0 : index
    %31 = vector.load %arg7[%c0_19, %c0_20] : memref<1x128xf32, #tpu.memory_space<vmem>>, vector<1x128xf32>
    %32 = vector.broadcast %31 : vector<1x128xf32> to vector<16x128xf32>
    %33 = arith.addf %30, %32 : vector<16x128xf32>
    %cst_21 = arith.constant dense<0xFF800000> : vector<16xf32>
    %34 = vector.multi_reduction <maximumf>, %33, %cst_21 [1] : vector<16x128xf32> to vector<16xf32>
    %35 = vector.shape_cast %34 : vector<16xf32> to vector<16x1xf32>
    %36 = vector.broadcast %35 : vector<16x1xf32> to vector<16x128xf32>
    %37 = arith.subf %33, %36 : vector<16x128xf32>
    %38 = math.exp %37 : vector<16x128xf32>
    %cst_22 = arith.constant dense<0.000000e+00> : vector<16xf32>
    %39 = vector.multi_reduction <add>, %38, %cst_22 [1] : vector<16x128xf32> to vector<16xf32>
    %40 = vector.shape_cast %39 : vector<16xf32> to vector<16x1xf32>
    %41 = tpu.reciprocal %40 {approx = true} : vector<16x1xf32> -> vector<16x1xf32>
    %42 = arith.mulf %40, %41 : vector<16x1xf32>
    %cst_23 = arith.constant 2.000000e+00 : f32
    %43 = vector.broadcast %cst_23 : f32 to vector<16x1xf32>
    %44 = arith.subf %43, %42 : vector<16x1xf32>
    %45 = arith.mulf %41, %44 : vector<16x1xf32>
    %46 = vector.broadcast %45 : vector<16x1xf32> to vector<16x128xf32>
    %47 = arith.mulf %38, %46 : vector<16x128xf32>
    %c0_24 = arith.constant 0 : index
    %c0_25 = arith.constant 0 : index
    %48 = vector.load %arg8[%c0_24, %c0_25] : memref<16x128xf32, #tpu.memory_space<vmem>>, vector<16x128xf32>
    tpu.vector_store %arg8[%c0_24, %c0_25], %47 {strides = array<i32>} : memref<16x128xf32, #tpu.memory_space<vmem>>, vector<16x128xf32>,
    return
  }
  func.func @transform_0(%arg0: i32) -> (i32, i32) {
    %c0_i32 = arith.constant 0 : i32
    %c0_i32_0 = arith.constant 0 : i32
    return %arg0, %c0_i32 : i32, i32
  }
  func.func @transform_1(%arg0: i32) -> (i32, i32) {
    %c0_i32 = arith.constant 0 : i32
    %c0_i32_0 = arith.constant 0 : i32
    %c0_i32_1 = arith.constant 0 : i32
    return %c0_i32, %c0_i32_0 : i32, i32
  }
  func.func @transform_2(%arg0: i32) -> (i32, i32) {
    %c0_i32 = arith.constant 0 : i32
    %c0_i32_0 = arith.constant 0 : i32
    %c0_i32_1 = arith.constant 0 : i32
    return %c0_i32, %c0_i32_0 : i32, i32
  }
  func.func @transform_3(%arg0: i32) -> (i32, i32) {
    %c0_i32 = arith.constant 0 : i32
    %c0_i32_0 = arith.constant 0 : i32
    %c0_i32_1 = arith.constant 0 : i32
    return %c0_i32, %c0_i32_0 : i32, i32
  }
  func.func @transform_4(%arg0: i32) -> (i32, i32) {
    %c0_i32 = arith.constant 0 : i32
    %c0_i32_0 = arith.constant 0 : i32
    %c0_i32_1 = arith.constant 0 : i32
    return %c0_i32, %c0_i32_0 : i32, i32
  }
  func.func @transform_5(%arg0: i32) -> (i32, i32) {
    %c0_i32 = arith.constant 0 : i32
    %c0_i32_0 = arith.constant 0 : i32
    %c0_i32_1 = arith.constant 0 : i32
    return %c0_i32, %c0_i32_0 : i32, i32
  }
  func.func @transform_6(%arg0: i32) -> (i32, i32) {
    %c0_i32 = arith.constant 0 : i32
    %c0_i32_0 = arith.constant 0 : i32
    %c0_i32_1 = arith.constant 0 : i32
    return %c0_i32, %c0_i32_0 : i32, i32
  }
  func.func @transform_7(%arg0: i32) -> (i32, i32) {
    %c0_i32 = arith.constant 0 : i32
    %c0_i32_0 = arith.constant 0 : i32
    return %arg0, %c0_i32 : i32, i32
  }
}

</mosaic_0001>

<bundles_post_ra>
// kernel: reinforce_forward.1
= control target key start
LH: loop header
LB: loop body
LE: loop exit
PB: predicated region body
PF: predicated region fallthrough
CT: control target
= control target key end

     0   :  { %12 = vsyncpa [#allocation3], 0  ;;  %s707_s0 = inlined_call_operand.vmem [shape: bf16[10,32], index: 0, kind: input, shape index: {}]   ;;  %s708_s1 = inlined_call_operand.vmem [shape: bf16[32,128], index: 1, kind: input, shape index: {}]   ;;  %s709_s2 = inlined_call_operand.vmem [shape: f32[1,128], index: 2, kind: input, shape index: {}]   ;;  %s710_s3 = inlined_call_operand.hbm [shape: bf16[128,128], index: 3, kind: input, shape index: {}]   ;;  %s711_s4 = inlined_call_operand.vmem [shape: f32[1,128], index: 4, kind: input, shape index: {}]   ;;  %s712_s5 = inlined_call_operand.hbm [shape: bf16[128,128], index: 5, kind: input, shape index: {}]   ;;  %s713_s6 = inlined_call_operand.vmem [shape: f32[1,128], index: 6, kind: input, shape index: {}]   ;;  %s714_s7 = inlined_call_operand.vmem [shape: f32[10,128], index: 7, kind: output, shape index: {}]  }
   0x1   :  { %13 = vsyncpa [#allocation5], 0  ;;  %s589_s24 = smov [#allocation2]   ;;  %s541_s28 = scalar_lea.hbm %s710_s3, 1024 }
   0x2   :  { %s25_s25 = sshll.u32 %s589_s24, 4  ;;  %p542_p0 = scmp.ne.s32.totalorder %s710_s3, %s541_s28  ;;  %s26_s25 = int_to_ptr.vmem [resolvable:$true] %s25_s25 }
   0x3   :  { %p545_p1 = scmp.lt.u32.totalorder %s541_s28, %s710_s3 }
   0x5   :  { %p547_p2 = pnand %p545_p1, %p542_p0 }
   0x7   :  { %550 = shalt.err (!%p547_p2)
}
   0x8   :  { %s551_s10 = scalar_lea.vmem %s26_s25, 1024  ;;  %p556_p4 = scmp.lt.s32.totalorder %s26_s25, %s26_s25 }
   0x9   :  { %p552_p3 = scmp.ne.s32.totalorder %s26_s25, %s551_s10  ;;  %p557_p5 = scmp.lt.s32.totalorder %s551_s10, %s551_s10 }
   0xb   :  { %p558_p6 = por %p557_p5, %p556_p4 }
   0xd   :  { %p559_p7 = pnand %p558_p6, %p552_p3 }
   0xf   :  { %562 = shalt.err (!%p559_p7)
}
  0x10   :  { %s590_s11 = smov 64   ;;  %s591_s12 = smov 4  }
  0x11   :  { %31 = dma.hbm_to_vmem [thread:$0]  %s710_s3, 1024, %s26_s25, [#allocation3], %s590_s11, %s590_s11, %s591_s12  }
  0x12   :  { %s592_s15 = smov [#allocation4]   ;;  %s563_s19 = scalar_lea.hbm %s712_s5, 1024 }
  0x13   :  { %s39_s16 = sshll.u32 %s592_s15, 4  ;;  %p564_p8 = scmp.ne.s32.totalorder %s712_s5, %s563_s19  ;;  %s40_s16 = int_to_ptr.vmem [resolvable:$true] %s39_s16 }
  0x14   :  { %p567_p9 = scmp.lt.u32.totalorder %s563_s19, %s712_s5 }
  0x16   :  { %p569_p10 = pnand %p567_p9, %p564_p8 }
  0x18   :  { %572 = shalt.err (!%p569_p10)
}
  0x19   :  { %s573_s24 = scalar_lea.vmem %s40_s16, 1024  ;;  %p578_p12 = scmp.lt.s32.totalorder %s40_s16, %s40_s16 }
  0x1a   :  { %p574_p11 = scmp.ne.s32.totalorder %s40_s16, %s573_s24  ;;  %p579_p13 = scmp.lt.s32.totalorder %s573_s24, %s573_s24 }
  0x1c   :  { %p580_p0 = por %p579_p13, %p578_p12 }
  0x1e   :  { %p581_p1 = pnand %p580_p0, %p574_p11 }
  0x20   :  { %584 = shalt.err (!%p581_p1)
}
  0x21   :  { %45 = dma.hbm_to_vmem [thread:$0]  %s712_s5, 1024, %s40_s16, [#allocation5], %s590_s11, %s590_s11, %s591_s12  }
  0x22   :  { %585 = dma.done.wait [#allocation3], 1024  }
  0x23   :  { %586 = vsyncadd [#allocation3], 4294966272 }
  0x24   :  { %587 = dma.done.wait [#allocation5], 1024  }
  0x25   :  { %588 = vsyncadd [#allocation5], 4294966272  ;;  %v593_v0 = vmov 0.0   ;;  %vm594_vm0 = vmmov 0   ;;  %v506_v1 = vld [vmem:[%s708_s1] sm:$0xff]   ;;  %v507_v2 = vld [vmem:[%s708_s1 + $0x8] sm:$0xff]  }
  0x26   :  { %452 = vmatprep.subr.bf16.mxu0 %v593_v0  ;;  %456 = vmatprep.mubr.msk.bf16.mxu0 %vm594_vm0, %v593_v0  ;;  %v509_v3 = vld [vmem:[#allocation2] sm:$0xff]   ;;  %vm85_vm1 = vcmask 261120   ;;  %v510_v5 = vld [vmem:[#allocation2 + $0x8] sm:$0xff]   ;;  %v511_v6 = vld [vmem:[#allocation2 + $0x10] sm:$0xff]  }
  0x27   :  { %460 = vmatprep.subr.bf16.mxu1 %v593_v0  ;;  %476 = vmatprep.mubr.msk.bf16.mxu1 %vm594_vm0, %v593_v0  ;;  %v508_v4 = vld [vmem:[%s707_s0] sm:$0xff]   ;;  %v512_v7 = vld [vmem:[#allocation2 + $0x18] sm:$0xff]   ;;  %v514_v9 = vld [vmem:[#allocation2 + $0x28] sm:$0xff]  }
  0x28   :  { %453 = vmatpush3.bf16.msra.mxu0 %v506_v1  ;;  %461 = vmatpush3.bf16.msra.mxu1 %v509_v3  ;;  %v513_v8 = vld [vmem:[#allocation2 + $0x20] sm:$0xff]   ;;  %v515_v10 = vld [vmem:[#allocation2 + $0x30] sm:$0xff]   ;;  %v516_v11 = vld [vmem:[#allocation2 + $0x38] sm:$0xff]  }
  0x29   :  { %454 = vmatprep.subr.bf16.mxu0 %v593_v0  ;;  %462 = vmatprep.subr.bf16.mxu1 %v593_v0  ;;  %v517_v12 = vld [vmem:[#allocation4] sm:$0xff]   ;;  %v518_v13 = vld [vmem:[#allocation4 + $0x8] sm:$0xff]   ;;  %v519_v32 = vld [vmem:[#allocation4 + $0x10] sm:$0xff]  }
  0x2a   :  { %v408_v14 = vld [vmem:[%s709_s2] ss:$0 sm:$0xff]  ;;  %v520_v33 = vld [vmem:[#allocation4 + $0x18] sm:$0xff]   ;;  %v522_v35 = vld [vmem:[#allocation4 + $0x28] sm:$0xff]  }
  0x2b   :  { %v521_v34 = vld [vmem:[#allocation4 + $0x20] sm:$0xff]   ;;  %v523_v36 = vld [vmem:[#allocation4 + $0x30] sm:$0xff]   ;;  %v524_v37 = vld [vmem:[#allocation4 + $0x38] sm:$0xff]  }
  0x2c   :  { %455 = vmatpush3.bf16.msra.mxu0 %v507_v2  ;;  %463 = vmatpush3.bf16.msra.mxu1 %v510_v5  ;;  %v413_v38 = vld [vmem:[%s711_s4] ss:$0 sm:$0xff] }
  0x2d   :  { %480 = vmatprep.subr.bf16.mxu0 %v593_v0  ;;  %464 = vmatprep.subr.bf16.mxu1 %v593_v0  ;;  %v422_v56 = vld [vmem:[%s713_s6] ss:$0 sm:$0xff] }
  0x2f   :  { %457 = vmatmul.mubr.msk.bf16.vlgmr.msra.gmra.mrb[0].mxu0 %vm85_vm1, %v508_v4 }
  0x30   :  { %496 = vmatprep.mubr.msk.bf16.mxu0 %vm594_vm0, %v593_v0  ;;  %465 = vmatpush3.bf16.msra.mxu1 %v511_v6 }
  0x31   :  { %466 = vmatprep.subr.bf16.mxu1 %v593_v0  ;;  %481 = vmatpush3.bf16.msra.mxu0 %v517_v12 }
  0x32   :  { %482 = vmatprep.subr.bf16.mxu0 %v593_v0 }
  0x34   :  { %467 = vmatpush3.bf16.msra.mxu1 %v512_v7 }
  0x35   :  { %468 = vmatprep.subr.bf16.mxu1 %v593_v0  ;;  %483 = vmatpush3.bf16.msra.mxu0 %v518_v13 }
  0x36   :  { %484 = vmatprep.subr.bf16.mxu0 %v593_v0 }
  0x38   :  { %469 = vmatpush3.bf16.msra.mxu1 %v513_v8 }
  0x39   :  { %470 = vmatprep.subr.bf16.mxu1 %v593_v0  ;;  %485 = vmatpush3.bf16.msra.mxu0 %v519_v32 }
  0x3a   :  { %486 = vmatprep.subr.bf16.mxu0 %v593_v0 }
  0x3c   :  { %471 = vmatpush3.bf16.msra.mxu1 %v514_v9 }
  0x3d   :  { %472 = vmatprep.subr.bf16.mxu1 %v593_v0  ;;  %487 = vmatpush3.bf16.msra.mxu0 %v520_v33 }
  0x3e   :  { %488 = vmatprep.subr.bf16.mxu0 %v593_v0 }
  0x40   :  { %473 = vmatpush3.bf16.msra.mxu1 %v515_v10 }
  0x41   :  { %474 = vmatprep.subr.bf16.mxu1 %v593_v0  ;;  %489 = vmatpush3.bf16.msra.mxu0 %v521_v34 }
  0x42   :  { %490 = vmatprep.subr.bf16.mxu0 %v593_v0 }
  0x44   :  { %475 = vmatpush3.bf16.msra.mxu1 %v516_v11 }
  0x45   :  { %491 = vmatpush3.bf16.msra.mxu0 %v522_v35 }
  0x46   :  { %492 = vmatprep.subr.bf16.mxu0 %v593_v0 }
  0x49   :  { %493 = vmatpush3.bf16.msra.mxu0 %v523_v36 }
  0x4a   :  { %494 = vmatprep.subr.bf16.mxu0 %v593_v0 }
  0x4d   :  { %495 = vmatpush3.bf16.msra.mxu0 %v524_v37 }
 0x102   :  { %v123_v15 = vpop.f32.mrb[0].mxu0 }
 0x103   :  { %v124_v16 = vadd.f32 %v408_v14, %v123_v15  ;;  %v458_v17 = vpop.f32.mrb[1].mxu0 }
 0x104   :  { %v126_v18 = vpop.f32.mrb[2].mxu0 }
 0x105   :  { %v132_v19 = vmul.f32 0.70710677, %v124_v16  ;;  %v127_v20 = vadd.f32 %v408_v14, %v126_v18  ;;  %v459_v21 = vpop.f32.mrb[3].mxu0  ;;  %v130_v26 = vmul.f32 0.5, %v124_v16 }
 0x107   :  { %525 = verf.f32 %v132_v19  ;;  %v133_v22 = vmul.f32 0.70710677, %v127_v20  ;;  %v131_v27 = vmul.f32 0.5, %v127_v20 }
 0x109   :  { %527 = verf.f32 %v133_v22 }
 0x111   :  { %v526_v23 = vpop.eup %525 }
 0x112   :  { %v136_v24 = vadd.f32 1.0, %v526_v23 }
 0x113   :  { %v528_v25 = vpop.eup %527 }
 0x114   :  { %v137_v28 = vadd.f32 1.0, %v528_v25  ;;  %v138_v29 = vmul.f32 %v136_v24, %v130_v26 }
 0x116   :  { %v139_v30 = vmul.f32 %v137_v28, %v131_v27 }
 0x118   :  { %v140_v31 = vpack.c.bf16 %v139_v30, %v138_v29 }
 0x11a   :  { %477 = vmatmul.mubr.bf16.vlgmr.msra.gmra.mrb[0].mxu1 %v140_v31 }
 0x1ed   :  { %v246_v39 = vpop.f32.mrb[0].mxu1 }
 0x1ee   :  { %v247_v40 = vadd.f32 %v413_v38, %v246_v39  ;;  %v478_v41 = vpop.f32.mrb[1].mxu1 }
 0x1ef   :  { %v249_v42 = vpop.f32.mrb[2].mxu1 }
 0x1f0   :  { %v255_v43 = vmul.f32 0.70710677, %v247_v40  ;;  %v250_v44 = vadd.f32 %v413_v38, %v249_v42  ;;  %v479_v45 = vpop.f32.mrb[3].mxu1  ;;  %v253_v50 = vmul.f32 0.5, %v247_v40 }
 0x1f2   :  { %529 = verf.f32 %v255_v43  ;;  %v256_v46 = vmul.f32 0.70710677, %v250_v44  ;;  %v254_v51 = vmul.f32 0.5, %v250_v44 }
 0x1f4   :  { %531 = verf.f32 %v256_v46 }
 0x1fc   :  { %v530_v47 = vpop.eup %529 }
 0x1fd   :  { %v259_v48 = vadd.f32 1.0, %v530_v47 }
 0x1fe   :  { %v532_v49 = vpop.eup %531 }
 0x1ff   :  { %v260_v52 = vadd.f32 1.0, %v532_v49  ;;  %v261_v53 = vmul.f32 %v259_v48, %v253_v50 }
 0x201   :  { %v262_v54 = vmul.f32 %v260_v52, %v254_v51 }
 0x203   :  { %v263_v55 = vpack.c.bf16 %v262_v54, %v261_v53 }
 0x205   :  { %497 = vmatmul.mubr.bf16.vlgmr.msra.gmra.mrb[4].mxu0 %v263_v55 }
 0x2d8   :  { %v369_v57 = vpop.f32.mrb[4].mxu0 }
 0x2d9   :  { %v370_v58 = vadd.f32 %v422_v56, %v369_v57  ;;  %v498_v59 = vpop.f32.mrb[5].mxu0 }
 0x2da   :  { %v372_v60 = vpop.f32.mrb[6].mxu0 }
 0x2db   :  { %376 = vmax.xlane.f32.xlu0 %v370_v58  ;;  %v499_v61 = vpop.f32.mrb[7].mxu0  ;;  %v373_v62 = vadd.f32 %v422_v56, %v372_v60 }
 0x2df   :  { %378 = vmax.xlane.f32.xlu0 %v373_v62 }
 0x368   :  { %v377_v63 = vpop.xlane.xlu0 %376 }
 0x369   :  { %v380_v0 = vsub.f32 %v370_v58, %v377_v63 }
 0x36b   :  { %v382_v1 = vmul.f32 1.442695, %v380_v0 }
 0x36c   :  { %v379_v2 = vpop.xlane.xlu0 %378 }
 0x36d   :  { %533 = vpow2.f32 %v382_v1  ;;  %v381_v3 = vsub.f32 %v373_v62, %v379_v2 }
 0x36f   :  { %v384_v4 = vmul.f32 1.442695, %v381_v3 }
 0x371   :  { %535 = vpow2.f32 %v384_v4 }
 0x377   :  { %v534_v5 = vpop.eup %533 }
 0x378   :  { %386 = vadd.xlane.f32.xlu1 %v534_v5 }
 0x37b   :  { %v536_v6 = vpop.eup %535 }
 0x37c   :  { %388 = vadd.xlane.f32.xlu1 %v536_v6 }
 0x405   :  { %v387_v7 = vpop.xlane.xlu1 %386 }
 0x406   :  { %537 = vrcp.f32 %v387_v7 }
 0x409   :  { %v389_v8 = vpop.xlane.xlu1 %388 }
 0x40a   :  { %539 = vrcp.f32 %v389_v8 }
 0x410   :  { %v538_v9 = vpop.eup %537 }
 0x411   :  { %v392_v10 = vmul.f32 %v538_v9, %v387_v7 }
 0x413   :  { %v394_v11 = vsub.f32 2.0, %v392_v10 }
 0x414   :  { %v540_v12 = vpop.eup %539 }
 0x415   :  { %v396_v13 = vmul.f32 %v538_v9, %v394_v11  ;;  %v393_v14 = vmul.f32 %v540_v12, %v389_v8 }
 0x417   :  { %v398_v15 = vmul.f32 %v534_v5, %v396_v13  ;;  %v395_v16 = vsub.f32 2.0, %v393_v14 }
 0x419   :  { %400 = vst [vmem:[%s714_s7] sm:$0xff] %v398_v15  ;;  %v397_v17 = vmul.f32 %v540_v12, %v395_v16 }
 0x41b   :  { %v399_v18 = vmul.f32 %v536_v6, %v397_v17 }
 0x41d   :  { %401 = vst [vmem:[%s714_s7 + $0x8] sm:$0xff] %v399_v18 }
 0x41e   :  { %406 = vsyncpa [#allocation3], 1 }
 0x41f   :  { %407 = vsyncpa [#allocation5], 1 }

</bundles_post_ra>
